<compile_context>
chip_gen: v6e
topology: v6e:2x2x1
jax: 0.10.0
libtpu: 0.0.40
codegen_flags: <defaults>
</compile_context>

<pallas_src>
import jax
import jax.numpy as jnp
from jax.experimental import pallas as pl
from jax.experimental.pallas import tpu as pltpu


def linear_kernel(x_ref, w_ref, b_ref, o_ref):
    """x_ref: (B, in_f) VMEM; w_ref: (out_f, in_f) SMEM; b_ref: (1, out_f) SMEM;
    o_ref: (B, out_f) VMEM.  Computes y = x @ W.T + b on the VPU."""
    x = x_ref[...]                        # (B, in_f)
    in_f = x_ref.shape[1]
    out_f = o_ref.shape[1]
    cols = []
    for j in range(out_f):                # static unroll: out_f == 2
        # Fuse bias into the accumulator init.
        acc = x[:, 0:1] * w_ref[j, 0] + b_ref[0, j]
        for k in range(1, in_f):          # static unroll: in_f == 2
            acc = acc + x[:, k:k + 1] * w_ref[j, k]
        cols.append(acc)
    # Single full-tile store instead of per-column masked stores.
    o_ref[...] = jnp.concatenate(cols, axis=1).astype(o_ref.dtype)


@jax.jit
def net_forward(x, weight, bias):
    """x: [B, in_f] f32; weight: [out_f, in_f] (PyTorch layout); bias: [out_f]."""
    B, in_f = x.shape
    out_f = weight.shape[0]
    b2d = bias.reshape(1, out_f)          # 2-D for SMEM

    y = pl.pallas_call(
        linear_kernel,
        out_shape=jax.ShapeDtypeStruct((B, out_f), x.dtype),
        in_specs=[
            pl.BlockSpec(memory_space=pltpu.MemorySpace.VMEM),   # x (vectors)
            pl.BlockSpec(memory_space=pltpu.MemorySpace.SMEM),   # weight scalars
            pl.BlockSpec(memory_space=pltpu.MemorySpace.SMEM),   # bias scalars
        ],
        out_specs=pl.BlockSpec(memory_space=pltpu.MemorySpace.VMEM),
    )(x, weight, b2d)
    # TODO(synk): if B ever scales, tile the batch axis with a grid (block rows
    # a multiple of 8, ideally 512-2048), mark it "parallel" (2 TCs on v7x),
    # present a lane-dense output, and budget blocks against v7x's 64 MiB VMEM.
    return y


if __name__ == "__main__":
    key = jax.random.PRNGKey(0)
    kx, kw, kb = jax.random.split(key, 3)

    B, IN, OUT = 8, 2, 2
    x = jax.random.normal(kx, (B, IN), dtype=jnp.float32)

    # PyTorch-style uniform(-1/sqrt(in), 1/sqrt(in)) Linear(2, 2) params.
    bound = 1.0 / jnp.sqrt(jnp.float32(IN))
    weight = jax.random.uniform(kw, (OUT, IN), minval=-bound, maxval=bound,
                                dtype=jnp.float32)
    bias = jax.random.uniform(kb, (OUT,), minval=-bound, maxval=bound,
                              dtype=jnp.float32)

    y = jax.block_until_ready(net_forward(x, weight, bias))

    # Exact-f32 reference (same math as torch F.linear).
    y_ref = jnp.matmul(x, weight.T, precision=jax.lax.Precision.HIGHEST) + bias
    assert y.shape == (B, OUT)
    assert jnp.allclose(y, y_ref, atol=1e-5, rtol=1e-5), "mismatch vs reference"

    print("KERNEL_OK")
</pallas_src>

<mosaic_0001>
module attributes {stable_mosaic.version = 11 : i64} {
  func.func @linear_kernel(%arg0: memref<8x2xf32, #tpu.memory_space<vmem>>, %arg1: memref<2x2xf32, #tpu.memory_space<smem>>, %arg2: memref<1x2xf32, #tpu.memory_space<smem>>, %arg3: memref<8x2xf32, #tpu.memory_space<vmem>>) attributes {dimension_semantics = [], scalar_prefetch = 0 : i64, scratch_operands = 0 : i64, tpu.core_type = #tpu.core_type<tc>} {
    %c0 = arith.constant 0 : index
    %c0_0 = arith.constant 0 : index
    %0 = vector.load %arg0[%c0, %c0_0] : memref<8x2xf32, #tpu.memory_space<vmem>>, vector<8x2xf32>
    %1 = vector.extract_strided_slice %0 {offsets = [0, 0], sizes = [8, 1], strides = [1, 1]} : vector<8x2xf32> to vector<8x1xf32>
    %c0_1 = arith.constant 0 : index
    %c0_2 = arith.constant 0 : index
    %2 = memref.load %arg1[%c0_1, %c0_2] : memref<2x2xf32, #tpu.memory_space<smem>>
    %3 = vector.broadcast %2 : f32 to vector<8x1xf32>
    %4 = arith.mulf %1, %3 : vector<8x1xf32>
    %c0_3 = arith.constant 0 : index
    %c0_4 = arith.constant 0 : index
    %5 = memref.load %arg2[%c0_3, %c0_4] : memref<1x2xf32, #tpu.memory_space<smem>>
    %6 = vector.broadcast %5 : f32 to vector<8x1xf32>
    %7 = arith.addf %4, %6 : vector<8x1xf32>
    %8 = vector.extract_strided_slice %0 {offsets = [0, 1], sizes = [8, 1], strides = [1, 1]} : vector<8x2xf32> to vector<8x1xf32>
    %c0_5 = arith.constant 0 : index
    %c1 = arith.constant 1 : index
    %9 = memref.load %arg1[%c0_5, %c1] : memref<2x2xf32, #tpu.memory_space<smem>>
    %10 = vector.broadcast %9 : f32 to vector<8x1xf32>
    %11 = arith.mulf %8, %10 : vector<8x1xf32>
    %12 = arith.addf %7, %11 : vector<8x1xf32>
    %13 = vector.extract_strided_slice %0 {offsets = [0, 0], sizes = [8, 1], strides = [1, 1]} : vector<8x2xf32> to vector<8x1xf32>
    %c1_6 = arith.constant 1 : index
    %c0_7 = arith.constant 0 : index
    %14 = memref.load %arg1[%c1_6, %c0_7] : memref<2x2xf32, #tpu.memory_space<smem>>
    %15 = vector.broadcast %14 : f32 to vector<8x1xf32>
    %16 = arith.mulf %13, %15 : vector<8x1xf32>
    %c0_8 = arith.constant 0 : index
    %c1_9 = arith.constant 1 : index
    %17 = memref.load %arg2[%c0_8, %c1_9] : memref<1x2xf32, #tpu.memory_space<smem>>
    %18 = vector.broadcast %17 : f32 to vector<8x1xf32>
    %19 = arith.addf %16, %18 : vector<8x1xf32>
    %20 = vector.extract_strided_slice %0 {offsets = [0, 1], sizes = [8, 1], strides = [1, 1]} : vector<8x2xf32> to vector<8x1xf32>
    %c1_10 = arith.constant 1 : index
    %c1_11 = arith.constant 1 : index
    %21 = memref.load %arg1[%c1_10, %c1_11] : memref<2x2xf32, #tpu.memory_space<smem>>
    %22 = vector.broadcast %21 : f32 to vector<8x1xf32>
    %23 = arith.mulf %20, %22 : vector<8x1xf32>
    %24 = arith.addf %19, %23 : vector<8x1xf32>
    %25 = tpu.concatenate %12, %24 in 1 : vector<8x1xf32>, vector<8x1xf32> -> vector<8x2xf32>
    %c0_12 = arith.constant 0 : index
    %c0_13 = arith.constant 0 : index
    %26 = vector.load %arg3[%c0_12, %c0_13] : memref<8x2xf32, #tpu.memory_space<vmem>>, vector<8x2xf32>
    tpu.vector_store %arg3[%c0_12, %c0_13], %25 {strides = array<i32>} : memref<8x2xf32, #tpu.memory_space<vmem>>, vector<8x2xf32>,
    return
  }
}

</mosaic_0001>

<bundles_post_ra>
// kernel: net_forward.1
= control target key start
LH: loop header
LB: loop body
LE: loop exit
PB: predicated region body
PF: predicated region fallthrough
CT: control target
= control target key end

     0   :  { %8 = vsyncpa [#allocation3], 0  ;;  %s154_s0 = inlined_call_operand.vmem [shape: f32[8,2], index: 0, kind: input, shape index: {}]   ;;  %s155_s1 = inlined_call_operand.vmem [shape: f32[2,2], index: 1, kind: input, shape index: {}]   ;;  %s156_s2 = inlined_call_operand.vmem [shape: f32[1,2], index: 2, kind: input, shape index: {}]   ;;  %s157_s3 = inlined_call_operand.vmem [shape: f32[8,2], index: 3, kind: output, shape index: {}]  }
   0x1   :  { %s18_s14 = sshll.u32 %s155_s1, 4  ;;  %s19_s14 = int_to_ptr.vmem [resolvable:$true] %s18_s14 }
   0x2   :  { %9 = vsyncpa [#allocation5], 0  ;;  %s28_s17 = sshll.u32 %s156_s2, 4  ;;  %s90_s18 = scalar_lea.vmem %s19_s14, 32  ;;  %s29_s17 = int_to_ptr.vmem [resolvable:$true] %s28_s17 }
   0x3   :  { %p91_p0 = scmp.ne.s32.totalorder %s19_s14, %s90_s18  ;;  %p95_p1 = scmp.lt.s32.totalorder %s19_s14, %s19_s14 }
   0x4   :  { %p96_p2 = scmp.lt.s32.totalorder %s90_s18, %s90_s18 }
   0x6   :  { %p97_p3 = por %p96_p2, %p95_p1 }
   0x8   :  { %p98_p4 = pnand %p97_p3, %p91_p0 }
   0xa   :  { %101 = shalt.err (!%p98_p4)
}
   0xb   :  { %s118_s19 = smov [#allocation2]   ;;  %s102_s20 = scalar_lea.vmem %s29_s17, 16 }
   0xc   :  { %21 = dma.vmem_to_smem %s19_s14, 32, %s118_s19, [#allocation3]  }
   0xd   :  { %p103_p5 = scmp.ne.s32.totalorder %s29_s17, %s102_s20  ;;  %p107_p6 = scmp.lt.s32.totalorder %s29_s17, %s29_s17 }
   0xe   :  { %p108_p7 = scmp.lt.s32.totalorder %s102_s20, %s102_s20 }
  0x10   :  { %p109_p8 = por %p108_p7, %p107_p6 }
  0x12   :  { %p110_p9 = pnand %p109_p8, %p103_p5 }
  0x14   :  { %113 = shalt.err (!%p110_p9)
}
  0x15   :  { %s119_s1 = smov [#allocation4]  }
  0x16   :  { %31 = dma.vmem_to_smem %s29_s17, 16, %s119_s1, [#allocation5]  }
  0x17   :  { %114 = dma.done.wait [#allocation3], 32  }
  0x18   :  { %115 = vsyncadd [#allocation3], 4294967264 }
  0x19   :  { %116 = dma.done.wait [#allocation5], 16  }
  0x1a   :  { %117 = vsyncadd [#allocation5], 4294967280 }
  0x1b   :  { %38 = sfence }
  0x1c   :  { %s85_s2 = sld [smem:[#allocation2 + $0x81]]  ;;  %v39_v0 = vld [vmem:[%s154_s0] sm:$0xff]  ;;  %s120_s24 = smov 127   ;;  %vm72_vm0 = vcmask 7168   ;;  %vm74_vm1 = vcmask 15360  }
  0x1d   :  { %s82_s21 = sld [smem:[#allocation2 + $0x1]]  ;;  %s121_s27 = smov 1  }
  0x1e   :  { %s83_s25 = sld [smem:[#allocation2 + $0x80]] }
  0x1f   :  { %s84_s26 = sld [smem:[#allocation4 + $0x1]] }
  0x20   :  { %s40_s28 = sld [smem:[#allocation2]] }
  0x21   :  { %s43_s29 = sld [smem:[#allocation4]] }
  0x22   :  { %v61_v1 = vstv %s85_s2 }
  0x23   :  { %v62_v2 = vmul.f32 %v61_v1, %v39_v0  ;;  %v47_v3 = vstv %s82_s21 }
  0x24   :  { %v48_v4 = vmul.f32 %v47_v3, %v39_v0  ;;  %v55_v5 = vstv %s83_s25 }
  0x25   :  { %64 = vrot.lane.b32.xlu0 %v62_v2, %s120_s24  ;;  %v56_v6 = vmul.f32 %v55_v5, %v39_v0  ;;  %v58_v7 = vstv %s84_s26 }
  0x26   :  { %v41_v11 = vstv %s40_s28 }
  0x27   :  { %v59_v8 = vadd.f32 %v58_v7, %v56_v6  ;;  %v42_v12 = vmul.f32 %v41_v11, %v39_v0  ;;  %v44_v13 = vstv %s43_s29 }
  0x29   :  { %50 = vrot.lane.b32.xlu0 %v48_v4, %s120_s24  ;;  %v45_v14 = vadd.f32 %v44_v13, %v42_v12 }
  0x97   :  { %v65_v9 = vpop.permute.xlu0 %64 }
  0x98   :  { %v67_v10 = vadd.f32 %v65_v9, %v59_v8 }
  0x9a   :  { %69 = vrot.lane.b32.xlu1 %v67_v10, %s121_s27 }
  0x9b   :  { %v51_v15 = vpop.permute.xlu0 %50 }
  0x9c   :  { %v53_v16 = vadd.f32 %v51_v15, %v45_v14 }
 0x10c   :  { %v70_v17 = vpop.permute.xlu1 %69 }
 0x10d   :  { %v73_v18 = vsel %vm72_vm0, %v53_v16, %v70_v17 }
 0x10e   :  { %75 = vst.msk [vmem:[%s157_s3] sm:$0xff] %vm74_vm1, %v73_v18 }
 0x10f   :  { %80 = vsyncpa [#allocation3], 1 }
 0x110   :  { %81 = vsyncpa [#allocation5], 1 }

</bundles_post_ra>
